<compile_context>
chip_gen: v7x
topology: tpu7x:2x2x1
jax: 0.10.0
libtpu: 0.0.40
codegen_flags: <defaults>
</compile_context>

<pallas_src>
import functools

import jax
import jax.numpy as jnp
from jax.experimental import pallas as pl
from jax.experimental.pallas import tpu as pltpu

ROW_ALIGN = 16   # bf16 sublane packing prefers row tiles that are multiples of 16


def _cdiv(a, b):
    return -(-a // b)


def _round_up(x, m):
    return _cdiv(x, m) * m


# ---------------------------------------------------------------------------
# Kernel: one row tile through the whole FCNet stack (all layers fused)
# ---------------------------------------------------------------------------
def _fcnet_fused_kernel(x_ref, *refs, num_layers, compute_dtype):
    """Fused FCNet on one (TN, in_dim) row tile.

    x_ref : (TN, in_dim)       VMEM (input dtype; cast to compute_dtype here)
    refs  : (w_0, b_0, ..., w_{L-1}, b_{L-1}, o_ref)
            w_l : (in_l, out_l) VMEM, compute_dtype (weight-norm folded,
                  pre-transposed -> x @ W, no in-kernel transpose)
            b_l : (1, out_l)    VMEM, f32
    o_ref : (TN, out_last)     VMEM, out dtype (bf16 on the production path)
    """
    o_ref = refs[-1]
    h = x_ref[...].astype(compute_dtype)       # cast in-kernel (no extra HBM pass)
    y = None
    for l in range(num_layers):
        w = refs[2 * l][...]
        b = refs[2 * l + 1][...]
        # MXU matmul with f32 accumulation; bias + ReLU epilogue stays in f32.
        y = jnp.dot(h, w, preferred_element_type=jnp.float32)
        y = jnp.maximum(y + b, 0.0)
        if l + 1 < num_layers:
            h = y.astype(compute_dtype)        # feed next MXU pass
    o_ref[...] = y.astype(o_ref.dtype)         # narrow only on the final store


# ---------------------------------------------------------------------------
# Parameter preparation (host side, done once)
# ---------------------------------------------------------------------------
def prepare_fcnet_params(params, compute_dtype=jnp.bfloat16):
    """Fold weight_norm (dim=None): W = g * v / ||v||_F, transpose to (in, out).

    Weights are stored in compute_dtype; biases stay f32 (f32 epilogue).
    Feature dims are left unpadded (all <= 128 here).
    """
    prepared = []
    for v, g, b in params:
        out_dim, _ = v.shape
        w_eff = v * (g.reshape(()) / jnp.linalg.norm(v))
        prepared.append((w_eff.T.astype(compute_dtype),
                         b.reshape(1, out_dim).astype(jnp.float32)))
    # NOTE: for realistic hidden widths (>128) on v6e/v7x, pad K/N of the big
    # layers to multiples of 256 and stream them with an inner emit_pipeline
    # instead of keeping every weight fully VMEM-resident.
    return prepared


# ---------------------------------------------------------------------------
# pallas_call wrapper
# ---------------------------------------------------------------------------
def _fcnet_pallas(h, prepared, rt, grid, compute_dtype, out_dtype):
    n, in_dim = h.shape
    num_layers = len(prepared)
    out_dim = prepared[-1][0].shape[1]

    in_specs = [pl.BlockSpec((rt, in_dim), lambda i: (i, 0))]
    flat_params = []
    for w, b in prepared:
        flat_params += [w, b]
        # Constant index_map -> fetched once and kept VMEM-resident across the
        # whole row grid (no per-step re-DMA).
        # TODO(synk): for realistic widths add pipeline_mode=pl.Buffered(1)
        # here to drop the default double-buffered copy of the weights.
        in_specs.append(pl.BlockSpec(w.shape, lambda i: (0, 0)))
        in_specs.append(pl.BlockSpec(b.shape, lambda i: (0, 0)))

    # VMEM budget: params (x2 for default double-buffering) + double-buffered
    # input/output tiles + f32 intermediates, plus headroom; clamped to a
    # range that is safe on v5e (128 MiB), v6e (128 MiB) and v7x (64 MiB).
    param_bytes = sum(w.size * w.dtype.itemsize + b.size * b.dtype.itemsize
                      for w, b in prepared)
    max_feat = max(w.shape[1] for w, _ in prepared)
    need = (2 * param_bytes
            + 2 * rt * in_dim * h.dtype.itemsize
            + 2 * rt * out_dim * jnp.dtype(out_dtype).itemsize
            + 4 * rt * max_feat * 4)
    vmem_limit = int(max(32 << 20, min(need + (8 << 20), 64 << 20)))

    kernel = functools.partial(
        _fcnet_fused_kernel, num_layers=num_layers, compute_dtype=compute_dtype)

    return pl.pallas_call(
        kernel,
        out_shape=jax.ShapeDtypeStruct((n, out_dim), out_dtype),
        grid=(grid,),
        in_specs=in_specs,
        out_specs=pl.BlockSpec((rt, out_dim), lambda i: (i, 0)),
        compiler_params=pltpu.CompilerParams(
            dimension_semantics=("parallel",),     # megacore sharding on v7x
            vmem_limit_bytes=vmem_limit),
    )(h, *flat_params)


@functools.partial(jax.jit,
                   static_argnames=("row_tile", "compute_dtype", "out_dtype"))
def fcnet_forward(x, prepared, *, row_tile=1024,
                  compute_dtype=jnp.bfloat16, out_dtype=None):
    """FCNet.forward: sequential (weight_norm Linear -> ReLU), fully fused."""
    if out_dtype is None:
        out_dtype = compute_dtype
    lead = x.shape[:-1]
    in_dim = x.shape[-1]
    out_dim = prepared[-1][0].shape[1]

    h = x.reshape(-1, in_dim)                 # metadata-only reshape
    n = h.shape[0]

    rt = min(row_tile, _round_up(n, ROW_ALIGN))
    # v7x has 2 TensorCores sharing the "parallel" grid axis: make sure the
    # row grid has >=2 steps whenever there are enough rows to split.
    if n >= 2 * ROW_ALIGN and _cdiv(n, rt) < 2:
        rt = _round_up(_cdiv(n, 2), ROW_ALIGN)
    grid = _cdiv(n, rt)

    out = _fcnet_pallas(h, prepared, rt, grid, compute_dtype, out_dtype)
    return out.reshape(*lead, out_dim)


# ---------------------------------------------------------------------------
# Deterministic init + pure-JAX reference
# ---------------------------------------------------------------------------
def init_fcnet_params(key, dims):
    """PyTorch-style init: v ~ U(-1/sqrt(in), 1/sqrt(in)), g = ||v||_F."""
    params = []
    for i in range(len(dims) - 1):
        in_dim, out_dim = dims[i], dims[i + 1]
        key, kw, kb = jax.random.split(key, 3)
        bound = 1.0 / jnp.sqrt(jnp.float32(in_dim))
        v = jax.random.uniform(kw, (out_dim, in_dim), jnp.float32, -bound, bound)
        b = jax.random.uniform(kb, (1, out_dim), jnp.float32, -bound, bound)
        g = jnp.linalg.norm(v).reshape(1, 1).astype(jnp.float32)
        params.append((v, g, b))
    return params


def fcnet_reference(x, params):
    """Pure-JAX f32 reference matching the PyTorch module."""
    h = x
    for v, g, b in params:
        w = v * (g.reshape(()) / jnp.linalg.norm(v))
        y = jnp.einsum("...i,oi->...o", h, w,
                       precision=jax.lax.Precision.HIGHEST)
        h = jnp.maximum(y + b.reshape(-1), 0.0)
    return h


if __name__ == "__main__":
    key = jax.random.PRNGKey(0)
    k_x, k_p = jax.random.split(key)

    dims = [32, 64, 32]                       # FCNet(dims)
    batch, seq = 2, 8
    x = jax.random.normal(k_x, (batch, seq, dims[0]), jnp.float32)
    params = init_fcnet_params(k_p, dims)
    ref = fcnet_reference(x, params)

    # 1) High-precision f32 validation path (not the deployment config).
    prep_f32 = prepare_fcnet_params(params, compute_dtype=jnp.float32)
    out_f32 = jax.block_until_ready(
        fcnet_forward(x, prep_f32, compute_dtype=jnp.float32))
    assert out_f32.shape == (batch, seq, dims[-1])
    assert jnp.allclose(out_f32, ref, atol=1e-4, rtol=1e-4), "f32 mismatch"

    # 2) Production path: bf16 MXU operands, f32 accumulate/epilogue,
    #    bf16 writeback (halves output HBM traffic).
    prep_bf16 = prepare_fcnet_params(params, compute_dtype=jnp.bfloat16)
    out_bf16 = jax.block_until_ready(
        fcnet_forward(x, prep_bf16, compute_dtype=jnp.bfloat16))
    assert out_bf16.shape == (batch, seq, dims[-1])
    assert jnp.allclose(out_bf16.astype(jnp.float32), ref,
                        atol=5e-2, rtol=5e-2), "bf16 mismatch"

    print("KERNEL_OK")
</pallas_src>

<mosaic_0001>
module attributes {stable_mosaic.version = 11 : i64} {
  func.func @_fcnet_fused_kernel(%arg0: i32, %arg1: memref<16x32xf32, #tpu.memory_space<vmem>>, %arg2: memref<32x64xf32, #tpu.memory_space<vmem>>, %arg3: memref<1x64xf32, #tpu.memory_space<vmem>>, %arg4: memref<64x32xf32, #tpu.memory_space<vmem>>, %arg5: memref<1x32xf32, #tpu.memory_space<vmem>>, %arg6: memref<16x32xf32, #tpu.memory_space<vmem>>) attributes {dimension_semantics = [#tpu.dimension_semantics<parallel>], iteration_bounds = array<i64: 1>, scalar_prefetch = 0 : i64, scratch_operands = 0 : i64, tpu.core_type = #tpu.core_type<tc>, window_params = [{transform_indices = @transform_0, window_bounds = array<i64: 16, 32>}, {pipeline_mode = #tpu.pipeline_mode<synchronous>, transform_indices = @transform_1, window_bounds = array<i64: 32, 64>}, {pipeline_mode = #tpu.pipeline_mode<synchronous>, transform_indices = @transform_2, window_bounds = array<i64: 1, 64>}, {pipeline_mode = #tpu.pipeline_mode<synchronous>, transform_indices = @transform_3, window_bounds = array<i64: 64, 32>}, {pipeline_mode = #tpu.pipeline_mode<synchronous>, transform_indices = @transform_4, window_bounds = array<i64: 1, 32>}, {transform_indices = @transform_5, window_bounds = array<i64: 16, 32>}]} {
    %c0 = arith.constant 0 : index
    %c0_0 = arith.constant 0 : index
    %0 = vector.load %arg1[%c0, %c0_0] : memref<16x32xf32, #tpu.memory_space<vmem>>, vector<16x32xf32>
    %c0_1 = arith.constant 0 : index
    %c0_2 = arith.constant 0 : index
    %1 = vector.load %arg2[%c0_1, %c0_2] : memref<32x64xf32, #tpu.memory_space<vmem>>, vector<32x64xf32>
    %c0_3 = arith.constant 0 : index
    %c0_4 = arith.constant 0 : index
    %2 = vector.load %arg3[%c0_3, %c0_4] : memref<1x64xf32, #tpu.memory_space<vmem>>, vector<1x64xf32>
    %cst = arith.constant dense<0.000000e+00> : vector<16x64xf32>
    %3 = tpu.matmul %0, %1, %cst {dimension_numbers = #tpu.dot_dimension_numbers<[1], [0], [0], [1], [0, 0, 1, 1], [], []>} : vector<16x32xf32>, vector<32x64xf32>, vector<16x64xf32> -> vector<16x64xf32>
    %4 = vector.broadcast %2 : vector<1x64xf32> to vector<16x64xf32>
    %5 = arith.addf %3, %4 : vector<16x64xf32>
    %cst_5 = arith.constant 0.000000e+00 : f32
    %6 = vector.broadcast %cst_5 : f32 to vector<16x64xf32>
    %7 = arith.maximumf %5, %6 : vector<16x64xf32>
    %c0_6 = arith.constant 0 : index
    %c0_7 = arith.constant 0 : index
    %8 = vector.load %arg4[%c0_6, %c0_7] : memref<64x32xf32, #tpu.memory_space<vmem>>, vector<64x32xf32>
    %c0_8 = arith.constant 0 : index
    %c0_9 = arith.constant 0 : index
    %9 = vector.load %arg5[%c0_8, %c0_9] : memref<1x32xf32, #tpu.memory_space<vmem>>, vector<1x32xf32>
    %cst_10 = arith.constant dense<0.000000e+00> : vector<16x32xf32>
    %10 = tpu.matmul %7, %8, %cst_10 {dimension_numbers = #tpu.dot_dimension_numbers<[1], [0], [0], [1], [0, 0, 1, 1], [], []>} : vector<16x64xf32>, vector<64x32xf32>, vector<16x32xf32> -> vector<16x32xf32>
    %11 = vector.broadcast %9 : vector<1x32xf32> to vector<16x32xf32>
    %12 = arith.addf %10, %11 : vector<16x32xf32>
    %cst_11 = arith.constant 0.000000e+00 : f32
    %13 = vector.broadcast %cst_11 : f32 to vector<16x32xf32>
    %14 = arith.maximumf %12, %13 : vector<16x32xf32>
    %c0_12 = arith.constant 0 : index
    %c0_13 = arith.constant 0 : index
    %15 = vector.load %arg6[%c0_12, %c0_13] : memref<16x32xf32, #tpu.memory_space<vmem>>, vector<16x32xf32>
    tpu.vector_store %arg6[%c0_12, %c0_13], %14 {strides = array<i32>} : memref<16x32xf32, #tpu.memory_space<vmem>>, vector<16x32xf32>,
    return
  }
  func.func @transform_0(%arg0: i32) -> (i32, i32) {
    %c0_i32 = arith.constant 0 : i32
    %c0_i32_0 = arith.constant 0 : i32
    return %arg0, %c0_i32 : i32, i32
  }
  func.func @transform_1(%arg0: i32) -> (i32, i32) {
    %c0_i32 = arith.constant 0 : i32
    %c0_i32_0 = arith.constant 0 : i32
    %c0_i32_1 = arith.constant 0 : i32
    return %c0_i32, %c0_i32_0 : i32, i32
  }
  func.func @transform_2(%arg0: i32) -> (i32, i32) {
    %c0_i32 = arith.constant 0 : i32
    %c0_i32_0 = arith.constant 0 : i32
    %c0_i32_1 = arith.constant 0 : i32
    return %c0_i32, %c0_i32_0 : i32, i32
  }
  func.func @transform_3(%arg0: i32) -> (i32, i32) {
    %c0_i32 = arith.constant 0 : i32
    %c0_i32_0 = arith.constant 0 : i32
    %c0_i32_1 = arith.constant 0 : i32
    return %c0_i32, %c0_i32_0 : i32, i32
  }
  func.func @transform_4(%arg0: i32) -> (i32, i32) {
    %c0_i32 = arith.constant 0 : i32
    %c0_i32_0 = arith.constant 0 : i32
    %c0_i32_1 = arith.constant 0 : i32
    return %c0_i32, %c0_i32_0 : i32, i32
  }
  func.func @transform_5(%arg0: i32) -> (i32, i32) {
    %c0_i32 = arith.constant 0 : i32
    %c0_i32_0 = arith.constant 0 : i32
    return %arg0, %c0_i32 : i32, i32
  }
}

</mosaic_0001>

<bundles_post_ra>
// kernel: fcnet_forward.1
= control target key start
LH: loop header
LB: loop body
LE: loop exit
PB: predicated region body
PF: predicated region fallthrough
CT: control target
= control target key end

     0   :  { %vm34_vm0 = vcmask 261120   ;;  %s435_s0 = inlined_call_operand.vmem [shape: f32[16,32], index: 0, kind: input, shape index: {}]   ;;  %s436_s1 = inlined_call_operand.vmem [shape: f32[32,64], index: 1, kind: input, shape index: {}]   ;;  %s437_s2 = inlined_call_operand.vmem [shape: f32[1,64], index: 2, kind: input, shape index: {}]   ;;  %s438_s3 = inlined_call_operand.vmem [shape: f32[64,32], index: 3, kind: input, shape index: {}]   ;;  %s439_s4 = inlined_call_operand.vmem [shape: f32[1,32], index: 4, kind: input, shape index: {}]   ;;  %s440_s5 = inlined_call_operand.hbm [shape: f32[16,32], index: 5, kind: output, shape index: {}]  }
   0x1   :  { %v23_v0 = vld [vmem:[%s436_s1] sm:$0xff]  ;;  %v24_v1 = vld [vmem:[%s436_s1 + $0x8] sm:$0xff]  ;;  %v25_v2 = vld [vmem:[%s436_s1 + $0x10] sm:$0xff] }
   0x2   :  { %v287_v3 = vpack.c.bf16 %v24_v1, %v23_v0  ;;  %v26_v4 = vld [vmem:[%s436_s1 + $0x18] sm:$0xff]  ;;  %v21_v5 = vld [vmem:[%s435_s0] sm:$0xff]  ;;  %v119_v8 = vld [vmem:[%s438_s3 + $0x8] sm:$0xff] }
   0x3   :  { %v291_v6 = vpack.c.bf16 %v26_v4, %v25_v2  ;;  %265 = vmatprep.mubr.msk.f32.mxu0 %vm34_vm0, %v21_v5  ;;  %v118_v7 = vld [vmem:[%s438_s3] sm:$0xff]  ;;  %v120_v9 = vld [vmem:[%s438_s3 + $0x10] sm:$0xff]  ;;  %v121_v11 = vld [vmem:[%s438_s3 + $0x18] sm:$0xff] }
   0x4   :  { %288 = vmatprep.subr.bf16.mxu0 %v287_v3  ;;  %v295_v10 = vpack.c.bf16 %v119_v8, %v118_v7  ;;  %v299_v12 = vpack.c.bf16 %v121_v11, %v120_v9  ;;  %v122_v13 = vld [vmem:[%s438_s3 + $0x20] sm:$0xff]  ;;  %v123_v14 = vld [vmem:[%s438_s3 + $0x28] sm:$0xff] }
   0x5   :  { %290 = vmatpush3.bf16.msra.mxu0 %v287_v3 }
   0x6   :  { %10 = vsyncpa [#allocation3], 0  ;;  %292 = vmatprep.subr.bf16.mxu0 %v291_v6  ;;  %296 = vmatprep.subr.bf16.mxu1 %v295_v10  ;;  %v303_v15 = vpack.c.bf16 %v123_v14, %v122_v13  ;;  %v22_v16 = vld [vmem:[%s435_s0 + $0x8] sm:$0xff]  ;;  %v124_v17 = vld [vmem:[%s438_s3 + $0x30] sm:$0xff]  ;;  %vm133_vm1 = vcmask 523264  }
   0x7   :  { %298 = vmatpush3.bf16.msra.mxu1 %v295_v10  ;;  %v125_v18 = vld [vmem:[%s438_s3 + $0x38] sm:$0xff]  ;;  %v235_v20 = vld [vmem:[%s437_s2] ss:$0 sm:$0xff]  ;;  %s338_s3 = smov [#allocation2]  }
   0x8   :  { %300 = vmatprep.subr.bf16.mxu1 %v299_v12  ;;  %v307_v19 = vpack.c.bf16 %v125_v18, %v124_v17  ;;  %v238_v27 = vld [vmem:[%s439_s4] ss:$0 sm:$0xff]  ;;  %s224_s23 = sshll.u32 %s338_s3, 4  ;;  %s225_s23 = int_to_ptr.vmem [resolvable:$true] %s224_s23 }
   0x9   :  { %294 = vmatpush3.bf16.msra.mxu0 %v291_v6  ;;  %s314_s2 = scalar_lea.vmem %s225_s23, 256  ;;  %p319_p1 = scmp.lt.s32.totalorder %s225_s23, %s225_s23 }
   0xa   :  { %p315_p0 = scmp.ne.s32.totalorder %s225_s23, %s314_s2  ;;  %p320_p2 = scmp.lt.s32.totalorder %s314_s2, %s314_s2 }
   0xb   :  { %302 = vmatpush3.bf16.msra.mxu1 %v299_v12 }
   0xc   :  { %266 = vmatmul.mubr.msk.f32.vlgmr.msra.gmra.mrb[0].mxu0 %vm34_vm0, %v22_v16  ;;  %304 = vmatprep.subr.bf16.mxu1 %v303_v15  ;;  %p321_p3 = por %p320_p2, %p319_p1 }
   0xe   :  { %p322_p4 = pnand %p321_p3, %p315_p0 }
   0xf   :  { %306 = vmatpush3.bf16.msra.mxu1 %v303_v15 }
  0x10   :  { %308 = vmatprep.subr.bf16.mxu1 %v307_v19 }
  0x13   :  { %310 = vmatpush3.bf16.msra.mxu1 %v307_v19 }
  0xdf   :  { %v267_v21 = vpop.f32.mrb[0].mxu0 }
  0xe0   :  { %v113_v22 = vadd.f32 %v267_v21, %v235_v20  ;;  %v107_v23 = vpop.f32.mrb[1].mxu0 }
  0xe1   :  { %v108_v24 = vadd.f32 %v235_v20, %v107_v23 }
  0xe2   :  { %v117_v26 = vmax.f32 %v113_v22, 0.0 }
  0xe3   :  { %v116_v25 = vmax.f32 %v108_v24, 0.0 }
  0xe5   :  { %284 = vmatprep.mubr.msk.f32.mxu1 %vm133_vm1, %v116_v25 }
  0xe6   :  { %285 = vmatmul.mubr.msk.f32.vlgmr.msra.gmra.mrb[0].mxu1 %vm133_vm1, %v117_v26 }
 0x1b9   :  { %v286_v28 = vpop.f32.mrb[0].mxu1 }
 0x1ba   :  { %v212_v29 = vadd.f32 %v286_v28, %v238_v27  ;;  %v206_v30 = vpop.f32.mrb[1].mxu1 }
 0x1bb   :  { %v207_v31 = vadd.f32 %v238_v27, %v206_v30 }
 0x1bc   :  { %v216_v32 = vmax.f32 %v212_v29, 0.0 }
 0x1bd   :  { %v215_v33 = vmax.f32 %v207_v31, 0.0 }
 0x1be   :  { %218 = vst.msk [vmem:[#allocation2 + $0x8] sm:$0xff] %vm34_vm0, %v216_v32 }
 0x1bf   :  { %217 = vst.msk [vmem:[#allocation2] sm:$0xff] %vm34_vm0, %v215_v33 }
 0x1c0   :  { %325 = shalt.err (!%p322_p4)
}
 0x1c1   :  { %s326_s25 = scalar_lea.hbm %s440_s5, 256 }
 0x1c2   :  { %p327_p5 = scmp.ne.s32.totalorder %s440_s5, %s326_s25  ;;  %p330_p6 = scmp.lt.u32.totalorder %s326_s25, %s440_s5 }
 0x1c4   :  { %p332_p7 = pnand %p330_p6, %p327_p5 }
 0x1c6   :  { %335 = shalt.err (!%p332_p7)
}
 0x1c7   :  { %s339_s30 = smov 128   ;;  %s340_s6 = smov 8  }
 0x1c8   :  { %230 = dma.vmem_to_hbm [thread:$0]  %s225_s23, 256, %s440_s5, [#allocation3], %s339_s30, %s339_s30, %s340_s6  }
 0x1c9   :  { %336 = dma.done.wait [#allocation3], 256  }
 0x1ca   :  { %337 = vsyncadd [#allocation3], 4294967040 }
 0x1cb   :  { %234 = vsyncpa [#allocation3], 1 }

</bundles_post_ra>
